<compile_context>
chip_gen: v7x
topology: tpu7x:2x2x1
jax: 0.10.0
libtpu: 0.0.40
codegen_flags: <defaults>
</compile_context>

<pallas_src>
import functools

import jax
import jax.numpy as jnp
from jax.experimental import pallas as pl
from jax.experimental.pallas import tpu as pltpu


def _round_up(n, m):
    return ((n + m - 1) // m) * m


def _vmem_budget_bytes(headroom=16 << 20):
    """Per-TensorCore scoped-VMEM budget = physical capacity minus headroom."""
    try:
        cap = int(pltpu.get_tpu_info().vmem_capacity_bytes)
    except Exception:
        cap = 64 << 20  # conservative (v7x-sized) fallback
    return int(max(cap - headroom, 16 << 20))


# ----------------------------------------------------------------------------
# Resident single-pass path: one [C, L] tile per batch (1 HBM read + 1 write).
# ----------------------------------------------------------------------------
def _se_resident_kernel(x_ref, w1_ref, b1_ref, w2_ref, b2_ref, o_ref, *, inv_len):
    # Squeeze: f32-accumulated sum over the time (lane) axis; no f32 copy of
    # the tile is kept live, only the [C, 1] stats are f32.
    s = jnp.sum(x_ref[...], axis=1, keepdims=True, dtype=jnp.float32) * inv_len  # [C, 1]

    # Excitation: two tiny matvecs + sigmoid.  Compute slots have huge slack
    # next to the DMA/HBM stream, so no MXU/VALU micro-optimization here.
    h = jnp.dot(w1_ref[...], s, preferred_element_type=jnp.float32) + b1_ref[...]
    h = jnp.maximum(h, 0.0)                                          # [Cse, 1]
    g = jnp.dot(w2_ref[...], h, preferred_element_type=jnp.float32) + b2_ref[...]
    g = jax.nn.sigmoid(g)                                            # [C, 1]

    # Scale: re-read the tile and multiply in its native dtype (keeps live
    # VMEM at one tile; the [C,1] gate broadcasts along lanes, no transpose).
    o_ref[...] = (x_ref[...] * g.astype(x_ref.dtype)).astype(o_ref.dtype)


def _se_resident(x, w1, b1, w2, b2, *, vmem_limit, donate_x):
    B, C, L = x.shape
    kernel = functools.partial(_se_resident_kernel, inv_len=float(1.0 / L))
    # TODO(synk): for B=1 on v7x one TensorCore idles; an L-split of the scale
    #             phase (as in the split path) would rebalance it.
    return pl.pallas_call(
        kernel,
        out_shape=jax.ShapeDtypeStruct((B, C, L), x.dtype),
        grid=(B,),
        in_specs=[
            # Full-extent blocks: last two dims equal the array dims, so no
            # wrapper-side padding is needed even for unaligned C or L.
            pl.BlockSpec((None, C, L), lambda b: (b, 0, 0)),          # x, per-batch tile
            pl.BlockSpec(w1.shape, lambda b: (0, 0)),                 # W1 (resident)
            pl.BlockSpec(b1.shape, lambda b: (0, 0)),                 # b1
            pl.BlockSpec(w2.shape, lambda b: (0, 0)),                 # W2 (resident)
            pl.BlockSpec(b2.shape, lambda b: (0, 0)),                 # b2
        ],
        out_specs=pl.BlockSpec((None, C, L), lambda b: (b, 0, 0)),
        input_output_aliases=({0: 0} if donate_x else {}),
        compiler_params=pltpu.CompilerParams(
            dimension_semantics=("parallel",),
            vmem_limit_bytes=int(vmem_limit)),
    )(x, w1, b1, w2, b2)


# ----------------------------------------------------------------------------
# Split path (large C*L / v7x 64 MiB VMEM): tiled squeeze + parallel scale.
# ----------------------------------------------------------------------------
def _se_split_squeeze_kernel(x_ref, s_ref, *, length, tile_l):
    l = pl.program_id(1)

    @pl.when(l == 0)
    def _():
        s_ref[...] = jnp.zeros_like(s_ref)

    if length % tile_l == 0:
        xv = x_ref[...].astype(jnp.float32)
    else:
        # Mask out-of-bounds lanes of the ragged last tile before summing.
        lane = jax.lax.broadcasted_iota(jnp.int32, x_ref.shape, dimension=1)
        valid = (l * tile_l + lane) < length
        xv = jnp.where(valid, x_ref[...].astype(jnp.float32), 0.0)
    s_ref[...] += jnp.sum(xv, axis=1, keepdims=True)


def _se_split_scale_kernel(g_ref, x_ref, o_ref):
    # Ragged last L-tile: garbage lanes in x_ref are computed but dropped on
    # the (bounded) output writeback, so no mask is needed here.
    o_ref[...] = (x_ref[...] * g_ref[...].astype(x_ref.dtype)).astype(o_ref.dtype)


def _se_split(x, w1, b1, w2, b2, *, vmem_limit):
    B, C, L = x.shape
    itemsize = jnp.dtype(x.dtype).itemsize

    # Per-step x block: lane-dense (multiple of 128), roughly >= ~1 MiB so the
    # ~0.35 us per-grid-step overhead stays negligible and DMA stays back-to-back.
    if L <= 256:
        tile_l = L  # full extent satisfies the (8,128) rule
    else:
        tile_l = _round_up(max(1, (1 << 20) // (C * itemsize)), 128)
        tile_l = max(128, min(tile_l, 2048, (L // 128) * 128))
    n_l = pl.cdiv(L, tile_l)
    # TODO(synk): consider pipeline_mode=pl.Buffered(3) on the x input of the
    #             scale kernel to hide DMA-issue jitter (per-step compute ~0).

    # Pass 1: per-batch f32 sums over L (output block is the accumulator).
    squeeze = functools.partial(_se_split_squeeze_kernel, length=L, tile_l=tile_l)
    sums = pl.pallas_call(
        squeeze,
        out_shape=jax.ShapeDtypeStruct((B, C, 1), jnp.float32),
        grid=(B, n_l),
        in_specs=[pl.BlockSpec((None, C, tile_l), lambda b, l: (b, 0, l))],
        out_specs=pl.BlockSpec((None, C, 1), lambda b, l: (b, 0, 0)),
        compiler_params=pltpu.CompilerParams(
            dimension_semantics=("parallel", "arbitrary"),
            vmem_limit_bytes=int(vmem_limit)),
    )(x)

    # Excitation on the tiny [B, C, 1] stats: plain JAX (negligible work).
    s = sums * (1.0 / L)
    h = jnp.maximum(jnp.einsum("oc,bcl->bol", w1, s) + b1[None], 0.0)
    g = jax.nn.sigmoid(jnp.einsum("oc,bcl->bol", w2, h) + b2[None])      # [B, C, 1] f32

    # Pass 2: gate * x over a fully parallel grid (feeds both v7x TCs).
    out = pl.pallas_call(
        _se_split_scale_kernel,
        out_shape=jax.ShapeDtypeStruct((B, C, L), x.dtype),
        grid=(B, n_l),
        in_specs=[
            pl.BlockSpec((None, C, 1), lambda b, l: (b, 0, 0)),          # gate, resident per b
            pl.BlockSpec((None, C, tile_l), lambda b, l: (b, 0, l)),     # x
        ],
        out_specs=pl.BlockSpec((None, C, tile_l), lambda b, l: (b, 0, l)),
        compiler_params=pltpu.CompilerParams(
            dimension_semantics=("parallel", "parallel"),
            vmem_limit_bytes=int(vmem_limit)),
    )(g, x)
    return out


# ----------------------------------------------------------------------------
# Dispatch wrapper.
# ----------------------------------------------------------------------------
def se_block(x, w1, b1, w2, b2, *, donate_x=False, force_split=False):
    """SEBlock forward (lengths=None path).

    x: [B, C, L]; w1: [Cse, C]; b1: [Cse, 1]; w2: [Cout, Cse]; b2: [Cout, 1].
    donate_x: alias the output onto x's HBM buffer (only if caller drops x).
    """
    B, C, L = x.shape
    Cse = w1.shape[0]
    Cout = w2.shape[0]
    assert Cout == C, "SEBlock scale requires out_channels == in_channels"
    assert w1.shape == (Cse, C) and w2.shape == (C, Cse)
    assert b1.shape == (Cse, 1) and b2.shape == (C, 1)

    itemsize = jnp.dtype(x.dtype).itemsize
    tile_bytes = C * L * itemsize
    weight_bytes = sum(int(a.size) * jnp.dtype(a.dtype).itemsize
                       for a in (w1, b1, w2, b2))
    budget = _vmem_budget_bytes()
    # Double-buffered input tile + double-buffered output tile + resident
    # weights (counted once) + small slack.
    resident_need = 4 * tile_bytes + weight_bytes + (1 << 20)

    if resident_need <= budget and not force_split:
        return _se_resident(x, w1, b1, w2, b2, vmem_limit=budget, donate_x=donate_x)
    return _se_split(x, w1, b1, w2, b2, vmem_limit=budget)


def se_block_reference(x, w1, b1, w2, b2):
    s = jnp.mean(x, axis=2, keepdims=True)                               # [B, C, 1]
    h = jnp.maximum(jnp.einsum("oc,bcl->bol", w1, s) + b1[None], 0.0)
    g = jax.nn.sigmoid(jnp.einsum("oc,bcl->bol", w2, h) + b2[None])
    return g * x


if __name__ == "__main__":
    key = jax.random.PRNGKey(0)
    # Small shapes consistent with the module; L deliberately NOT a multiple
    # of 128 to exercise the no-pad / no-slice full-extent block path.
    B, C, Cse, L = 2, 16, 8, 50

    k_x, k_w1, k_b1, k_w2, k_b2 = jax.random.split(key, 5)
    x = jax.random.normal(k_x, (B, C, L), dtype=jnp.float32)

    # Deterministic parameter init (conv1: [Cse, C, 1] -> [Cse, C], etc.)
    w1 = jax.random.normal(k_w1, (Cse, C), dtype=jnp.float32) * 0.1
    b1 = jax.random.normal(k_b1, (Cse, 1), dtype=jnp.float32) * 0.1
    w2 = jax.random.normal(k_w2, (C, Cse), dtype=jnp.float32) * 0.1
    b2 = jax.random.normal(k_b2, (C, 1), dtype=jnp.float32) * 0.1

    # Resident single-pass path (default on all generations at this size).
    ref = se_block_reference(x, w1, b1, w2, b2)
    out = jax.block_until_ready(se_block(x, w1, b1, w2, b2))
    assert out.shape == (B, C, L)
    assert jnp.allclose(out, ref, atol=1e-5, rtol=1e-5)

    # Split path (tiled squeeze + fully parallel scale), forced at a small
    # ragged L so the multi-tile accumulation + edge masking are exercised.
    L2 = 300
    x2 = jax.random.normal(jax.random.PRNGKey(1), (B, C, L2), dtype=jnp.float32)
    ref2 = se_block_reference(x2, w1, b1, w2, b2)
    out2 = jax.block_until_ready(se_block(x2, w1, b1, w2, b2, force_split=True))
    assert out2.shape == (B, C, L2)
    assert jnp.allclose(out2, ref2, atol=1e-5, rtol=1e-5)

    print("KERNEL_OK")
</pallas_src>

<mosaic_0001>
module attributes {stable_mosaic.version = 11 : i64} {
  func.func @_se_resident_kernel(%arg0: i32, %arg1: memref<1x16x50xf32, #tpu.memory_space<vmem>>, %arg2: memref<8x16xf32, #tpu.memory_space<vmem>>, %arg3: memref<8x1xf32, #tpu.memory_space<vmem>>, %arg4: memref<16x8xf32, #tpu.memory_space<vmem>>, %arg5: memref<16x1xf32, #tpu.memory_space<vmem>>, %arg6: memref<1x16x50xf32, #tpu.memory_space<vmem>>) attributes {dimension_semantics = [#tpu.dimension_semantics<parallel>], iteration_bounds = array<i64: 2>, scalar_prefetch = 0 : i64, scratch_operands = 0 : i64, tpu.core_type = #tpu.core_type<tc>, window_params = [{transform_indices = @transform_0, window_bounds = array<i64: 1, 16, 50>}, {pipeline_mode = #tpu.pipeline_mode<synchronous>, transform_indices = @transform_1, window_bounds = array<i64: 8, 16>}, {pipeline_mode = #tpu.pipeline_mode<synchronous>, transform_indices = @transform_2, window_bounds = array<i64: 8, 1>}, {pipeline_mode = #tpu.pipeline_mode<synchronous>, transform_indices = @transform_3, window_bounds = array<i64: 16, 8>}, {pipeline_mode = #tpu.pipeline_mode<synchronous>, transform_indices = @transform_4, window_bounds = array<i64: 16, 1>}, {transform_indices = @transform_5, window_bounds = array<i64: 1, 16, 50>}]} {
    %c0 = arith.constant 0 : index
    %c0_0 = arith.constant 0 : index
    %c0_1 = arith.constant 0 : index
    %0 = vector.load %arg1[%c0, %c0_0, %c0_1] : memref<1x16x50xf32, #tpu.memory_space<vmem>>, vector<1x16x50xf32>
    %1 = vector.shape_cast %0 : vector<1x16x50xf32> to vector<16x50xf32>
    %cst = arith.constant dense<0.000000e+00> : vector<16xf32>
    %2 = vector.multi_reduction <add>, %1, %cst [1] : vector<16x50xf32> to vector<16xf32>
    %3 = vector.shape_cast %2 : vector<16xf32> to vector<16x1xf32>
    %cst_2 = arith.constant 2.000000e-02 : f32
    %4 = vector.broadcast %cst_2 : f32 to vector<16x1xf32>
    %5 = arith.mulf %3, %4 : vector<16x1xf32>
    %c0_3 = arith.constant 0 : index
    %c0_4 = arith.constant 0 : index
    %6 = vector.load %arg2[%c0_3, %c0_4] : memref<8x16xf32, #tpu.memory_space<vmem>>, vector<8x16xf32>
    %cst_5 = arith.constant dense<0.000000e+00> : vector<8x1xf32>
    %7 = tpu.matmul %6, %5, %cst_5 {dimension_numbers = #tpu.dot_dimension_numbers<[1], [0], [0], [1], [0, 0, 1, 1], [], []>} : vector<8x16xf32>, vector<16x1xf32>, vector<8x1xf32> -> vector<8x1xf32>
    %c0_6 = arith.constant 0 : index
    %c0_7 = arith.constant 0 : index
    %8 = vector.load %arg3[%c0_6, %c0_7] : memref<8x1xf32, #tpu.memory_space<vmem>>, vector<8x1xf32>
    %9 = arith.addf %7, %8 : vector<8x1xf32>
    %cst_8 = arith.constant 0.000000e+00 : f32
    %10 = vector.broadcast %cst_8 : f32 to vector<8x1xf32>
    %11 = arith.maximumf %9, %10 : vector<8x1xf32>
    %c0_9 = arith.constant 0 : index
    %c0_10 = arith.constant 0 : index
    %12 = vector.load %arg4[%c0_9, %c0_10] : memref<16x8xf32, #tpu.memory_space<vmem>>, vector<16x8xf32>
    %cst_11 = arith.constant dense<0.000000e+00> : vector<16x1xf32>
    %13 = tpu.matmul %12, %11, %cst_11 {dimension_numbers = #tpu.dot_dimension_numbers<[1], [0], [0], [1], [0, 0, 1, 1], [], []>} : vector<16x8xf32>, vector<8x1xf32>, vector<16x1xf32> -> vector<16x1xf32>
    %c0_12 = arith.constant 0 : index
    %c0_13 = arith.constant 0 : index
    %14 = vector.load %arg5[%c0_12, %c0_13] : memref<16x1xf32, #tpu.memory_space<vmem>>, vector<16x1xf32>
    %15 = arith.addf %13, %14 : vector<16x1xf32>
    %16 = arith.negf %15 : vector<16x1xf32>
    %17 = math.exp %16 : vector<16x1xf32>
    %cst_14 = arith.constant 1.000000e+00 : f32
    %18 = vector.broadcast %cst_14 : f32 to vector<16x1xf32>
    %19 = arith.addf %18, %17 : vector<16x1xf32>
    %20 = arith.divf %18, %19 : vector<16x1xf32>
    %c0_15 = arith.constant 0 : index
    %c0_16 = arith.constant 0 : index
    %c0_17 = arith.constant 0 : index
    %21 = vector.load %arg1[%c0_15, %c0_16, %c0_17] : memref<1x16x50xf32, #tpu.memory_space<vmem>>, vector<1x16x50xf32>
    %22 = vector.shape_cast %21 : vector<1x16x50xf32> to vector<16x50xf32>
    %23 = vector.broadcast %20 : vector<16x1xf32> to vector<16x50xf32>
    %24 = arith.mulf %22, %23 : vector<16x50xf32>
    %c0_18 = arith.constant 0 : index
    %c0_19 = arith.constant 0 : index
    %c0_20 = arith.constant 0 : index
    %25 = vector.load %arg6[%c0_18, %c0_19, %c0_20] : memref<1x16x50xf32, #tpu.memory_space<vmem>>, vector<1x16x50xf32>
    %26 = vector.shape_cast %25 : vector<1x16x50xf32> to vector<16x50xf32>
    %27 = vector.shape_cast %24 : vector<16x50xf32> to vector<1x16x50xf32>
    tpu.vector_store %arg6[%c0_18, %c0_19, %c0_20], %27 {strides = array<i32>} : memref<1x16x50xf32, #tpu.memory_space<vmem>>, vector<1x16x50xf32>,
    return
  }
  func.func @transform_0(%arg0: i32) -> (i32, i32, i32) {
    %c0_i32 = arith.constant 0 : i32
    %c0_i32_0 = arith.constant 0 : i32
    %c0_i32_1 = arith.constant 0 : i32
    return %arg0, %c0_i32, %c0_i32_0 : i32, i32, i32
  }
  func.func @transform_1(%arg0: i32) -> (i32, i32) {
    %c0_i32 = arith.constant 0 : i32
    %c0_i32_0 = arith.constant 0 : i32
    %c0_i32_1 = arith.constant 0 : i32
    return %c0_i32, %c0_i32_0 : i32, i32
  }
  func.func @transform_2(%arg0: i32) -> (i32, i32) {
    %c0_i32 = arith.constant 0 : i32
    %c0_i32_0 = arith.constant 0 : i32
    %c0_i32_1 = arith.constant 0 : i32
    return %c0_i32, %c0_i32_0 : i32, i32
  }
  func.func @transform_3(%arg0: i32) -> (i32, i32) {
    %c0_i32 = arith.constant 0 : i32
    %c0_i32_0 = arith.constant 0 : i32
    %c0_i32_1 = arith.constant 0 : i32
    return %c0_i32, %c0_i32_0 : i32, i32
  }
  func.func @transform_4(%arg0: i32) -> (i32, i32) {
    %c0_i32 = arith.constant 0 : i32
    %c0_i32_0 = arith.constant 0 : i32
    %c0_i32_1 = arith.constant 0 : i32
    return %c0_i32, %c0_i32_0 : i32, i32
  }
  func.func @transform_5(%arg0: i32) -> (i32, i32, i32) {
    %c0_i32 = arith.constant 0 : i32
    %c0_i32_0 = arith.constant 0 : i32
    %c0_i32_1 = arith.constant 0 : i32
    return %arg0, %c0_i32, %c0_i32_0 : i32, i32, i32
  }
}

</mosaic_0001>

<bundles_post_ra>
// kernel: tpu_custom_call.1
= control target key start
LH: loop header
LB: loop body
LE: loop exit
PB: predicated region body
PF: predicated region fallthrough
CT: control target
= control target key end

     0   :  { %10 = vsyncpa [#allocation3], 0  ;;  %s824_s0 = inlined_call_operand.vmem [shape: f32[2,16,50], index: 0, kind: input, shape index: {}]   ;;  %s825_s1 = inlined_call_operand.vmem [shape: f32[8,16], index: 1, kind: input, shape index: {}]   ;;  %s826_s2 = inlined_call_operand.vmem [shape: f32[8,1], index: 2, kind: input, shape index: {}]   ;;  %s827_s3 = inlined_call_operand.vmem [shape: f32[16,8], index: 3, kind: input, shape index: {}]   ;;  %s828_s4 = inlined_call_operand.vmem [shape: f32[16,1], index: 4, kind: input, shape index: {}]   ;;  %s829_s5 = inlined_call_operand.hbm [shape: f32[2,16,50], index: 5, kind: output, shape index: {}]  }
   0x1   :  { %12 = vsyncpa [#allocation3 + $0x1], 0  ;;  %s695_s18 = smov 0   ;;  %s697_s19 = smov 0  }
   0x2   :  { %s699_s20 = smov 0   ;;  %s701_s21 = smov 0  }
   0x3 LB: > { %s716_s22 = sadd.s32 4294967295, %s656_s21   ;;  %s499_s23 = sadd.s32 4294967294, %s656_s21   ;;  %s656_s21 = sphi %s701_s21, %s835_s21   ;;  %s652_s20 = sphi %s699_s20, %s834_s20   ;;  %s648_s19 = sphi %s697_s19, %s833_s19   ;;  %s644_s18 = sphi %s695_s18, %s832_s18  }
   0x4   : > { %s720_s24 = sadd.s32 1, %s656_s21   ;;  %s135_s25 = sadd.s32 1, %s652_s20 }
   0x5   : > { %s132_s26 = ssub.s32 %s656_s21, %s720_s24  ;;  %p145_p0 = scmp.ne.s32.totalorder %s652_s20, %s648_s19 }
   0x6   : > { %p133_p1 = scmp.eq.s32.totalorder %s132_s26, 0  ;;  %p146_p2 = scmp.eq.s32.totalorder %s716_s22, 1 }
   0x7   : > { %p151_p3 = scmp.ne.s32.totalorder %s648_s19, %s644_s18  ;;  %p152_p4 = scmp.eq.s32.totalorder %s499_s23, 1 }
   0x8   : > { %s731_s27 = scalar_select %p133_p1, %s652_s20, %s135_s25  }
   0x9   : > { %p733_p5 = por %p146_p2, %p145_p0  ;;  %p737_p6 = por %p152_p4, %p151_p3 }
   0xa   : > { %p502_p7 = scmp.ge.s32.totalorder %s656_s21, 1  ;;  %p190_p8 = scmp.lt.s32.totalorder %s656_s21, 3 }
   0xc   : > { %p191_p9 = pnand %p502_p7, %p190_p8 }
   0xd   : > { %p218_p10 = scmp.lt.s32.totalorder (!%p191_p9), %s716_s22, 1  ;;  %vm225_vm0 = vcmask (!%p191_p9), 408576   ;;  %v658_v4 = vmov (!%p191_p9), 0.0|0.0   ;;  %vm659_vm1 = vmmov (!%p191_p9), 0   ;;  %v660_v5 = vmov (!%p191_p9), 0.0   ;;  %v234_v11 = vld [vmem:[%s825_s1] sm:$0xff] (!%p191_p9) }
   0xe   : > { %194 = sbr.rel (%p191_p9) target bundleno = 788 (0x314), region = 40  ;;  %536 = vmatprep.subr.bf16.mxu0 (!%p191_p9), %v658_v4  ;;  %528 = vmatprep.mubr.msk.f32.mxu0 (!%p191_p9), %vm659_vm1, %v660_v5  ;;  %vm236_vm2 = vcmask (!%p191_p9), 130048   ;;  %v311_v12 = vld [vmem:[%s827_s3] sm:$0xff] (!%p191_p9)  ;;  %vm315_vm3 = vcmask (!%p191_p9), 64512   ;;  %v312_v18 = vld [vmem:[%s827_s3 + $0x8] sm:$0xff] (!%p191_p9)  ;;  %v661_v19 = vmov (!%p191_p9), 0  }
   0xf   : > { %533 = vmatprep.mubr.msk.f32.mxu1 (!%p191_p9), %vm315_vm3, %v311_v12  ;;  %v235_v13 = vld [vmem:[%s826_s2] sm:$0xff] (!%p191_p9)  ;;  %584 = vset.pattern.permute.xlu1 (!%p191_p9), %v661_v19  ;;  %v314_v20 = vld [vmem:[%s828_s4 + $0x8] sm:$0xff] (!%p191_p9)  ;;  %s517_s10 = sshll.u32 (!%p191_p9), %s716_s22, 8  ;;  %s662_s15 = smov (!%p191_p9), [#allocation2]  }
  0x10   : > { %585 = vset.pattern.permute.xlu0 (!%p191_p9), %v661_v19  ;;  %v313_v21 = vld [vmem:[%s828_s4] sm:$0xff] (!%p191_p9)  ;;  %s779_s13 = scalar_lea.hbm (!%p191_p9), %s829_s5, %s517_s10  ;;  %s598_s16 = sshll.u32 (!%p191_p9), %s662_s15, 4  ;;  %s599_s16 = int_to_ptr.vmem [resolvable:$false] %s598_s16 }
  0x11   : > { %s600_s17 = scalar_lea.vmem (!%p191_p9), %s599_s16, 512 }
  0x15   : > { %s219_s30 = scalar_select %p218_p10, %s716_s22, 1 }
  0x17   : > { %s516_s6 = sshll.u32 %s219_s30, 4 }
  0x18   : > { %s222_s9 = scalar_lea.vmem %s824_s0, %s516_s6  ;;  %s215_s6 = sand.u32 1, %s648_s19  }
  0x19   : > { %v223_v0 = vld [vmem:[%s222_s9] sm:$0xff]  ;;  %v748_v1 = vld [vmem:[%s222_s9 + $0x8] sm:$0xff]  ;;  %s503_s7 = sshll.u32 %s215_s6, 4  ;;  %s783_s14 = scalar_lea.sflag [#allocation3], %s215_s6 }
  0x1a   : > { %v226_v2 = vsel %vm225_vm0, %v223_v0, 0.0  ;;  %v229_v3 = vsel %vm225_vm0, %v748_v1, 0.0  ;;  %s217_s8 = scalar_lea.vmem [#allocation2], %s503_s7 }
  0x1b   : > { %227 = vadd.xlane.f32.xlu0 %v226_v2  ;;  %s437_s9 = sshll.u32 %s217_s8, 4  ;;  %s774_s9 = int_to_ptr.vmem [resolvable:$true] %s437_s9 }
  0x1c   : > { %s594_s22 = scalar_lea.vmem %s774_s9, 256  ;;  %p601_p0 = scmp.lt.s32.totalorder %s774_s9, %s599_s16 }
  0x1d   : > { %p595_p11 = scmp.ne.s32.totalorder %s774_s9, %s594_s22  ;;  %p602_p1 = scmp.lt.s32.totalorder %s600_s17, %s594_s22 }
  0x1f   : > { %230 = vadd.xlane.f32.xlu0 %v229_v3  ;;  %p596_p12 = pnand %p595_p11, %p733_p5  ;;  %p603_p2 = por %p602_p1, %p601_p0 }
  0x21   : > { %p597_p13 = pneg %p596_p12 }
  0x23   : > { %p604_p3 = pnand %p603_p2, %p597_p13 }
  0xa8   : > { %v228_v6 = vpop.xlane.xlu0 %227 }
  0xa9   : > { %v232_v8 = vmul.f32 0.02, %v228_v6 }
  0xac   : > { %v231_v7 = vpop.xlane.xlu0 %230 }
  0xad   : > { %v233_v9 = vmul.f32 0.02, %v231_v7 }
  0xaf   : > { %v537_v10 = vpack.c.bf16 %v233_v9, %v232_v8 }
  0xb1   : > { %538 = vmatpush3.bf16.msra.mxu0 %v537_v10 }
  0xb4   : > { %529 = vmatmul.mubr.msk.f32.vlgmr.msra.gmra.mrb[0].mxu0 %vm236_vm2, %v234_v11 }
 0x187   : > { %v306_v14 = vpop.f32.mrb[0].mxu0 }
 0x188   : > { %v307_v15 = vadd.f32 %v306_v14, %v235_v13  ;;  %v530_v16 = vpop.f32.mrb[1].mxu0 }
 0x18a   : > { %v310_v17 = vmax.f32 %v307_v15, 0.0 }
 0x18c   : > { %531 = vmatprep.subr.mxu1 %v310_v17 }
 0x18d   : > { %532 = vmatpush3.msra.mxu1 %v310_v17 }
 0x18e   : > { %534 = vmatmul.mubr.msk.f32.vlgmr.msra.gmra.mrb[0].mxu1 %vm315_vm3, %v312_v18 }
 0x261   : > { %v535_v22 = vpop.f32.mrb[0].mxu1 }
 0x262   : > { %v394_v23 = vadd.f32 %v535_v22, %v314_v20  ;;  %v388_v24 = vpop.f32.mrb[1].mxu1 }
 0x263   : > { %v389_v25 = vadd.f32 %v388_v24, %v313_v21 }
 0x264   : > { %v510_v26 = vmul.f32 -1.442695, %v394_v23 }
 0x265   : > { %v509_v27 = vmul.f32 -1.442695, %v389_v25 }
 0x266   : > { %586 = vpow2.f32 %v510_v26 }
 0x267   : > { %588 = vpow2.f32 %v509_v27 }
 0x270   : > { %v587_v28 = vpop.eup %586 }
 0x271   : > { %v589_v29 = vpop.eup %588  ;;  %v404_v31 = vadd.f32 1.0, %v587_v28 }
 0x272   : > { %v403_v30 = vadd.f32 1.0, %v589_v29 }
 0x274   : > { %590 = vrcp.f32 %v403_v30 }
 0x275   : > { %592 = vrcp.f32 %v404_v31 }
 0x27e   : > { %v591_v32 = vpop.eup %590 }
 0x27f   : > { %411 = vperm.xlu1 %584, %v591_v32   ;;  %v593_v33 = vpop.eup %592 }
 0x283   : > { %416 = vperm.xlu1 %584, %v593_v33  }
 0x2fe   : > { %v412_v34 = vpop.permute.xlu1 %411 }
 0x2ff   : > { %v419_v35 = vmul.f32 %v412_v34, %v223_v0 }
 0x301   : > { %421 = vst.msk [vmem:[%s217_s8] sm:$0xff] %vm225_vm0, %v419_v35 }
 0x302   : > { %v417_v36 = vpop.permute.xlu1 %416 }
 0x303   : > { %v420_v37 = vmul.f32 %v417_v36, %v748_v1 }
 0x305   : > { %422 = vst.msk [vmem:[%s217_s8 + $0x8] sm:$0xff] %vm225_vm0, %v420_v37 }
 0x306   : > { %607 = shalt.err (!%p604_p3)
}
 0x307   : > { %s608_s23 = scalar_lea.hbm %s779_s13, 256  ;;  %s612_s30 = scalar_lea.hbm %s829_s5, 512 }
 0x308   : > { %p609_p4 = scmp.ne.s32.totalorder %s779_s13, %s608_s23  ;;  %p613_p9 = scmp.lt.u32.totalorder %s779_s13, %s829_s5 }
 0x309   : > { %p614_p10 = scmp.lt.u32.totalorder %s612_s30, %s608_s23  ;;  %p616_p12 = scmp.lt.u32.totalorder %s608_s23, %s779_s13 }
 0x30a   : > { %p610_p7 = pnand %p609_p4, %p733_p5 }
 0x30b   : > { %p615_p11 = por %p614_p10, %p613_p9 }
 0x30c   : > { %p611_p8 = pneg %p610_p7 }
 0x30d   : > { %p617_p13 = por %p616_p12, %p615_p11 }
 0x30f   : > { %p618_p0 = pnand %p617_p13, %p611_p8 }
 0x311   : > { %621 = shalt.err (!%p618_p0)
}
 0x312   : > { %s663_s8 = smov 128   ;;  %s664_s10 = smov 8  }
 0x313   : > { %539 = dma.vmem_to_hbm [thread:$0]  (%p733_p5), %s774_s9, 256, %s779_s13, %s783_s14, %s663_s8, %s663_s8, %s664_s10  }
 0x314 PF: > { %p545_p1 = scmp.ge.s32.totalorder %s656_s21, 2  ;;  %s452_s11 = sand.u32 1, %s644_s18  }
 0x315   : > { %s453_s12 = scalar_lea.sflag [#allocation3], %s452_s11 }
 0x316   : > { %p542_p2 = pnand %p545_p1, %p737_p6 }
 0x318   : > { %639 = dma.done.wait (!%p542_p2), %s453_s12, 256  }
 0x319   : > { %641 = vsyncadd (!%p542_p2), %s453_s12, 4294967040  ;;  %p15_p3 = scmp.ge.s32.totalorder %s720_s24, 4   ;;  %s832_s18 = smov %s648_s19 }
 0x31a   : > { %s833_s19 = smov %s652_s20  ;;  %s834_s20 = smov %s731_s27 }
 0x31b   : > { %s835_s21 = smov %s720_s24  ;;  %17 = sbr.rel (!%p15_p3) target bundleno = 3 (0x3), region = 75 }
 0x322   :  { %458 = vsyncpa [#allocation3], 1 }
 0x323   :  { %460 = vsyncpa [#allocation3 + $0x1], 1 }

</bundles_post_ra>
